<compile_context>
chip_gen: v7x
topology: tpu7x:2x2x1
jax: 0.10.0
libtpu: 0.0.40
codegen_flags: <defaults>
</compile_context>

<pallas_src>
import math
from functools import partial

import jax
import jax.numpy as jnp
from jax.experimental import pallas as pl
from jax.experimental.pallas import tpu as pltpu

_EPS = 1e-5          # PyTorch BatchNorm2d default eps
_SLOPE = 0.2         # LeakyReLU negative slope
_TM_MAX = 256        # row-tile target; conservative for v7x (64 MiB VMEM) and v5e
_TK_MAX = 1024       # K reduction tile (multiple of 128)
_VMEM_LIMIT = 32 * 1024 * 1024


def _round_up(a, b):
    return (a + b - 1) // b * b


# ---------------------------------------------------------------------------
# Kernel 1a: tiled matmul (+ optional fused LeakyReLU) for layers WITHOUT BN
# ---------------------------------------------------------------------------
def _mm_act_kernel(x_ref, w_ref, y_ref, acc_ref, *, act, slope):
    k = pl.program_id(1)

    @pl.when(k == 0)
    def _init():
        acc_ref[...] = jnp.zeros_like(acc_ref)

    acc_ref[...] += jnp.dot(x_ref[...], w_ref[...],
                            preferred_element_type=jnp.float32)

    @pl.when(k == pl.num_programs(1) - 1)
    def _finish():
        y = acc_ref[...]
        if act:
            y = jnp.where(y >= 0, y, slope * y)
        y_ref[...] = y.astype(y_ref.dtype)


# ---------------------------------------------------------------------------
# Kernel 1b: tiled matmul emitting pre-BN output + per-tile [sum, sum(x^2)]
# ---------------------------------------------------------------------------
def _mm_stats_kernel(x_ref, w_ref, y_ref, stats_ref, acc_ref):
    k = pl.program_id(1)

    @pl.when(k == 0)
    def _init():
        acc_ref[...] = jnp.zeros_like(acc_ref)

    acc_ref[...] += jnp.dot(x_ref[...], w_ref[...],
                            preferred_element_type=jnp.float32)

    @pl.when(k == pl.num_programs(1) - 1)
    def _finish():
        y = acc_ref[...]
        y_ref[...] = y
        stats_ref[0, 0:1, :] = jnp.sum(y, axis=0, keepdims=True)
        stats_ref[0, 1:2, :] = jnp.sum(y * y, axis=0, keepdims=True)


# ---------------------------------------------------------------------------
# Kernel 2: fused BatchNorm-apply (precomputed scale/shift) + LeakyReLU
# ---------------------------------------------------------------------------
def _bn_act_kernel(y_ref, scale_ref, shift_ref, o_ref, *, slope):
    y = y_ref[...] * scale_ref[...] + shift_ref[...]      # f32 epilogue math
    o_ref[...] = jnp.where(y >= 0, y, slope * y).astype(o_ref.dtype)


# ---------------------------------------------------------------------------
# pallas_call wrappers
# ---------------------------------------------------------------------------
def _run_matmul(x_cols, w_mat, *, tm, tk, act, out_dtype, with_stats):
    mp, kp = x_cols.shape
    ocp = w_mat.shape[1]
    m_tiles, k_tiles = mp // tm, kp // tk

    in_specs = [
        pl.BlockSpec((tm, tk), lambda i, k: (i, k)),
        pl.BlockSpec((tk, ocp), lambda i, k: (k, 0)),
    ]
    scratch = [pltpu.VMEM((tm, ocp), jnp.float32)]
    cparams = pltpu.CompilerParams(
        dimension_semantics=("parallel", "arbitrary"),
        vmem_limit_bytes=_VMEM_LIMIT,
    )

    if with_stats:
        y, stats = pl.pallas_call(
            _mm_stats_kernel,
            out_shape=(
                jax.ShapeDtypeStruct((mp, ocp), jnp.float32),          # pre-BN y
                jax.ShapeDtypeStruct((m_tiles, 2, ocp), jnp.float32),  # per-tile stats
            ),
            grid=(m_tiles, k_tiles),
            in_specs=in_specs,
            out_specs=(
                pl.BlockSpec((tm, ocp), lambda i, k: (i, 0)),
                pl.BlockSpec((1, 2, ocp), lambda i, k: (i, 0, 0)),
            ),
            scratch_shapes=scratch,
            compiler_params=cparams,
        )(x_cols, w_mat)
        return y, stats

    y = pl.pallas_call(
        partial(_mm_act_kernel, act=act, slope=_SLOPE),
        out_shape=jax.ShapeDtypeStruct((mp, ocp), out_dtype),
        grid=(m_tiles, k_tiles),
        in_specs=in_specs,
        out_specs=pl.BlockSpec((tm, ocp), lambda i, k: (i, 0)),
        scratch_shapes=scratch,
        compiler_params=cparams,
    )(x_cols, w_mat)
    return y, None


def _run_bn_act(y, scale, shift, *, tm, out_dtype):
    mp, ocp = y.shape
    m_tiles = mp // tm
    return pl.pallas_call(
        partial(_bn_act_kernel, slope=_SLOPE),
        out_shape=jax.ShapeDtypeStruct((mp, ocp), out_dtype),
        grid=(m_tiles,),
        in_specs=[
            pl.BlockSpec((tm, ocp), lambda i: (i, 0)),
            pl.BlockSpec((1, ocp), lambda i: (0, 0)),
            pl.BlockSpec((1, ocp), lambda i: (0, 0)),
        ],
        out_specs=pl.BlockSpec((tm, ocp), lambda i: (i, 0)),
        compiler_params=pltpu.CompilerParams(
            dimension_semantics=("parallel",),
            vmem_limit_bytes=_VMEM_LIMIT,
        ),
    )(y, scale, shift)


# ---------------------------------------------------------------------------
# Plain-JAX glue: im2col for NHWC activations
# ---------------------------------------------------------------------------
def _im2col_nhwc(x, k, stride, pad):
    n, h, w, c = x.shape
    if pad:
        x = jnp.pad(x, ((0, 0), (pad, pad), (pad, pad), (0, 0)))
    hp, wp = h + 2 * pad, w + 2 * pad
    ho = (hp - k) // stride + 1
    wo = (wp - k) // stride + 1
    patches = []
    for i in range(k):
        for j in range(k):
            patches.append(
                x[:, i:i + stride * (ho - 1) + 1:stride,
                     j:j + stride * (wo - 1) + 1:stride, :])
    cols = jnp.stack(patches, axis=3)            # (N, Ho, Wo, k*k, C)
    return cols.reshape(n * ho * wo, k * k * c), ho, wo


# ---------------------------------------------------------------------------
# One Conv_block (Conv2d [+ BN] [+ LeakyReLU]) via the kernels above
# ---------------------------------------------------------------------------
def _conv_layer(x_nhwc, w_oihw, gamma, beta, cfg, *, out_dtype):
    n = x_nhwc.shape[0]
    k, s, p = cfg['k'], cfg['s'], cfg['p']
    ic, oc = cfg['in_ch'], cfg['out_ch']

    cols, ho, wo = _im2col_nhwc(x_nhwc, k, s, p)
    m, kk = cols.shape

    # Tile sizing + padding: lane-dense OC, (16,128)-aligned bf16 blocks.
    mp = _round_up(m, 16)
    tm = mp if mp <= _TM_MAX else _TM_MAX
    mp = _round_up(m, tm)
    kp = _round_up(kk, 128)
    tk = kp if kp <= _TK_MAX else _TK_MAX
    kp = _round_up(kk, tk)
    ocp = _round_up(oc, 128)

    cols = jnp.pad(cols.astype(jnp.bfloat16), ((0, mp - m), (0, kp - kk)))
    # OIHW -> (KH, KW, IC, OC) -> (K, OC): matches the im2col patch ordering.
    w_mat = jnp.transpose(w_oihw, (2, 3, 1, 0)).reshape(k * k * ic, oc)
    w_mat = jnp.pad(w_mat.astype(jnp.bfloat16), ((0, kp - kk), (0, ocp - oc)))

    if cfg['bn']:
        y, stats = _run_matmul(cols, w_mat, tm=tm, tk=tk, act=False,
                               out_dtype=jnp.float32, with_stats=True)
        # Cross-tile reduction of the per-tile stats (tiny), then scale/shift.
        sums = jnp.sum(stats, axis=0)                       # (2, OCp)
        mean = sums[0] / m                                  # true M, zero-pad safe
        var = jnp.maximum(sums[1] / m - mean * mean, 0.0)
        inv = jax.lax.rsqrt(var + _EPS)
        gamma_p = jnp.pad(gamma, (0, ocp - oc))
        beta_p = jnp.pad(beta, (0, ocp - oc))
        scale = (gamma_p * inv).reshape(1, ocp).astype(jnp.float32)
        shift = (beta_p - mean * gamma_p * inv).reshape(1, ocp).astype(jnp.float32)
        out = _run_bn_act(y, scale, shift, tm=tm, out_dtype=out_dtype)
    else:
        out, _ = _run_matmul(cols, w_mat, tm=tm, tk=tk, act=cfg['act'],
                             out_dtype=out_dtype, with_stats=False)

    return out[:m, :oc].reshape(n, ho, wo, oc)


# ---------------------------------------------------------------------------
# DCGAN_Discriminator (Pallas implementation)
# ---------------------------------------------------------------------------
class DCGANDiscriminatorPallas:
    def __init__(self, key, in_ch=3, out_ch=1, ndf=64, img_size=128):
        layers = [dict(in_ch=in_ch, out_ch=ndf, k=4, s=2, p=1, bn=False, act=True)]
        ch = ndf
        for _ in range(int(math.log2(img_size // 8))):
            layers.append(dict(in_ch=ch, out_ch=ch * 2, k=4, s=2, p=1,
                               bn=True, act=True))
            ch *= 2
        # final plain Conv2d: bias=False, no norm, no activation
        layers.append(dict(in_ch=ch, out_ch=out_ch, k=4, s=1, p=0,
                           bn=False, act=False))
        self.layers = layers

        # deterministic synthetic parameters (all convs are bias-free per the spec)
        self.params = []
        for cfg in layers:
            key, wk = jax.random.split(key)
            w = 0.02 * jax.random.normal(
                wk, (cfg['out_ch'], cfg['in_ch'], cfg['k'], cfg['k']),
                jnp.float32)                                    # OIHW (PyTorch)
            gamma = jnp.ones((cfg['out_ch'],), jnp.float32)     # BN weight
            beta = jnp.zeros((cfg['out_ch'],), jnp.float32)     # BN bias
            self.params.append((w, gamma, beta))

    def __call__(self, x_nchw):
        x = jnp.transpose(x_nchw, (0, 2, 3, 1)).astype(jnp.bfloat16)   # -> NHWC bf16
        last = len(self.layers) - 1
        for idx, (cfg, (w, gamma, beta)) in enumerate(zip(self.layers, self.params)):
            out_dtype = jnp.float32 if idx == last else jnp.bfloat16
            x = _conv_layer(x, w, gamma, beta, cfg, out_dtype=out_dtype)
        return jnp.transpose(x, (0, 3, 1, 2))                           # back to NCHW


# ---------------------------------------------------------------------------
if __name__ == "__main__":
    key = jax.random.PRNGKey(0)
    pkey, xkey = jax.random.split(key)

    # Small shapes consistent with the module: img_size=16 -> 1 downsampling
    # block, so layers: (4->8, /2), (8->16 +BN, /2), final (16->1, k4 s1 p0).
    model = DCGANDiscriminatorPallas(pkey, in_ch=4, out_ch=1, ndf=8, img_size=16)
    x = jax.random.normal(xkey, (2, 4, 16, 16), jnp.float32)   # NCHW input

    fwd = jax.jit(lambda inp: model(inp))
    out = fwd(x)
    jax.block_until_ready(out)

    assert out.shape == (2, 1, 1, 1), out.shape
    assert bool(jnp.all(jnp.isfinite(out)))
    print("KERNEL_OK")
</pallas_src>

<mosaic_0001>
module attributes {stable_mosaic.version = 11 : i64} {
  func.func @_mm_act_kernel(%arg0: i32, %arg1: i32, %arg2: memref<128x128xbf16, #tpu.memory_space<vmem>>, %arg3: memref<128x128xbf16, #tpu.memory_space<vmem>>, %arg4: memref<128x128xbf16, #tpu.memory_space<vmem>>, %arg5: memref<128x128xf32, #tpu.memory_space<vmem>>) attributes {dimension_semantics = [#tpu.dimension_semantics<parallel>, #tpu.dimension_semantics<arbitrary>], iteration_bounds = array<i64: 1, 1>, scalar_prefetch = 0 : i64, scratch_operands = 1 : i64, tpu.core_type = #tpu.core_type<tc>, window_params = [{transform_indices = @transform_0, window_bounds = array<i64: 128, 128>}, {transform_indices = @transform_1, window_bounds = array<i64: 128, 128>}, {transform_indices = @transform_2, window_bounds = array<i64: 128, 128>}]} {
    %c0_i32 = arith.constant 0 : i32
    %0 = arith.cmpi eq, %arg1, %c0_i32 : i32
    %1 = arith.extui %0 : i1 to i32
    %c0_i32_0 = arith.constant 0 : i32
    %2 = arith.cmpi ne, %1, %c0_i32_0 : i32
    scf.if %2 {
      %cst_10 = arith.constant 0.000000e+00 : f32
      %12 = vector.broadcast %cst_10 : f32 to vector<128x128xf32>
      %c0_11 = arith.constant 0 : index
      %c0_12 = arith.constant 0 : index
      %13 = vector.load %arg5[%c0_11, %c0_12] : memref<128x128xf32, #tpu.memory_space<vmem>>, vector<128x128xf32>
      tpu.vector_store %arg5[%c0_11, %c0_12], %12 {strides = array<i32>} : memref<128x128xf32, #tpu.memory_space<vmem>>, vector<128x128xf32>,
    } else {
    }
    %c0 = arith.constant 0 : index
    %c0_1 = arith.constant 0 : index
    %3 = vector.load %arg5[%c0, %c0_1] : memref<128x128xf32, #tpu.memory_space<vmem>>, vector<128x128xf32>
    %c0_2 = arith.constant 0 : index
    %c0_3 = arith.constant 0 : index
    %4 = vector.load %arg2[%c0_2, %c0_3] : memref<128x128xbf16, #tpu.memory_space<vmem>>, vector<128x128xbf16>
    %c0_4 = arith.constant 0 : index
    %c0_5 = arith.constant 0 : index
    %5 = vector.load %arg3[%c0_4, %c0_5] : memref<128x128xbf16, #tpu.memory_space<vmem>>, vector<128x128xbf16>
    %cst = arith.constant dense<0.000000e+00> : vector<128x128xf32>
    %6 = tpu.matmul %4, %5, %cst {dimension_numbers = #tpu.dot_dimension_numbers<[1], [0], [0], [1], [0, 0, 1, 1], [], []>} : vector<128x128xbf16>, vector<128x128xbf16>, vector<128x128xf32> -> vector<128x128xf32>
    %7 = arith.addf %3, %6 : vector<128x128xf32>
    %c0_6 = arith.constant 0 : index
    %c0_7 = arith.constant 0 : index
    %8 = vector.load %arg5[%c0_6, %c0_7] : memref<128x128xf32, #tpu.memory_space<vmem>>, vector<128x128xf32>
    tpu.vector_store %arg5[%c0_6, %c0_7], %7 {strides = array<i32>} : memref<128x128xf32, #tpu.memory_space<vmem>>, vector<128x128xf32>,
    %c0_i32_8 = arith.constant 0 : i32
    %9 = arith.cmpi eq, %arg1, %c0_i32_8 : i32
    %10 = arith.extui %9 : i1 to i32
    %c0_i32_9 = arith.constant 0 : i32
    %11 = arith.cmpi ne, %10, %c0_i32_9 : i32
    scf.if %11 {
      %c0_10 = arith.constant 0 : index
      %c0_11 = arith.constant 0 : index
      %12 = vector.load %arg5[%c0_10, %c0_11] : memref<128x128xf32, #tpu.memory_space<vmem>>, vector<128x128xf32>
      %cst_12 = arith.constant 0.000000e+00 : f32
      %13 = vector.broadcast %cst_12 : f32 to vector<128x128xf32>
      %14 = arith.cmpf oge, %12, %13 : vector<128x128xf32>
      %cst_13 = arith.constant 2.000000e-01 : f32
      %15 = vector.broadcast %cst_13 : f32 to vector<128x128xf32>
      %16 = arith.mulf %15, %12 : vector<128x128xf32>
      %17 = arith.select %14, %12, %16 : vector<128x128xi1>, vector<128x128xf32>
      %18 = arith.truncf %17 : vector<128x128xf32> to vector<128x128xbf16>
      %c0_14 = arith.constant 0 : index
      %c0_15 = arith.constant 0 : index
      %19 = vector.load %arg4[%c0_14, %c0_15] : memref<128x128xbf16, #tpu.memory_space<vmem>>, vector<128x128xbf16>
      tpu.vector_store %arg4[%c0_14, %c0_15], %18 {strides = array<i32>} : memref<128x128xbf16, #tpu.memory_space<vmem>>, vector<128x128xbf16>,
    } else {
    }
    return
  }
  func.func @transform_0(%arg0: i32, %arg1: i32) -> (i32, i32) {
    %c0_i32 = arith.constant 0 : i32
    return %arg0, %arg1 : i32, i32
  }
  func.func @transform_1(%arg0: i32, %arg1: i32) -> (i32, i32) {
    %c0_i32 = arith.constant 0 : i32
    %c0_i32_0 = arith.constant 0 : i32
    return %arg1, %c0_i32 : i32, i32
  }
  func.func @transform_2(%arg0: i32, %arg1: i32) -> (i32, i32) {
    %c0_i32 = arith.constant 0 : i32
    %c0_i32_0 = arith.constant 0 : i32
    return %arg0, %c0_i32 : i32, i32
  }
}

module attributes {stable_mosaic.version = 11 : i64} {
  func.func @_bn_act_kernel(%arg0: i32, %arg1: memref<32x128xf32, #tpu.memory_space<vmem>>, %arg2: memref<1x128xf32, #tpu.memory_space<vmem>>, %arg3: memref<1x128xf32, #tpu.memory_space<vmem>>, %arg4: memref<32x128xbf16, #tpu.memory_space<vmem>>) attributes {dimension_semantics = [#tpu.dimension_semantics<parallel>], iteration_bounds = array<i64: 1>, scalar_prefetch = 0 : i64, scratch_operands = 0 : i64, tpu.core_type = #tpu.core_type<tc>, window_params = [{transform_indices = @transform_0, window_bounds = array<i64: 32, 128>}, {pipeline_mode = #tpu.pipeline_mode<synchronous>, transform_indices = @transform_1, window_bounds = array<i64: 1, 128>}, {pipeline_mode = #tpu.pipeline_mode<synchronous>, transform_indices = @transform_2, window_bounds = array<i64: 1, 128>}, {transform_indices = @transform_3, window_bounds = array<i64: 32, 128>}]} {
    %c0 = arith.constant 0 : index
    %c0_0 = arith.constant 0 : index
    %0 = vector.load %arg1[%c0, %c0_0] : memref<32x128xf32, #tpu.memory_space<vmem>>, vector<32x128xf32>
    %c0_1 = arith.constant 0 : index
    %c0_2 = arith.constant 0 : index
    %1 = vector.load %arg2[%c0_1, %c0_2] : memref<1x128xf32, #tpu.memory_space<vmem>>, vector<1x128xf32>
    %2 = vector.broadcast %1 : vector<1x128xf32> to vector<32x128xf32>
    %3 = arith.mulf %0, %2 : vector<32x128xf32>
    %c0_3 = arith.constant 0 : index
    %c0_4 = arith.constant 0 : index
    %4 = vector.load %arg3[%c0_3, %c0_4] : memref<1x128xf32, #tpu.memory_space<vmem>>, vector<1x128xf32>
    %5 = vector.broadcast %4 : vector<1x128xf32> to vector<32x128xf32>
    %6 = arith.addf %3, %5 : vector<32x128xf32>
    %cst = arith.constant 0.000000e+00 : f32
    %7 = vector.broadcast %cst : f32 to vector<32x128xf32>
    %8 = arith.cmpf oge, %6, %7 : vector<32x128xf32>
    %cst_5 = arith.constant 2.000000e-01 : f32
    %9 = vector.broadcast %cst_5 : f32 to vector<32x128xf32>
    %10 = arith.mulf %9, %6 : vector<32x128xf32>
    %11 = arith.select %8, %6, %10 : vector<32x128xi1>, vector<32x128xf32>
    %12 = arith.truncf %11 : vector<32x128xf32> to vector<32x128xbf16>
    %c0_6 = arith.constant 0 : index
    %c0_7 = arith.constant 0 : index
    %13 = vector.load %arg4[%c0_6, %c0_7] : memref<32x128xbf16, #tpu.memory_space<vmem>>, vector<32x128xbf16>
    tpu.vector_store %arg4[%c0_6, %c0_7], %12 {strides = array<i32>} : memref<32x128xbf16, #tpu.memory_space<vmem>>, vector<32x128xbf16>,
    return
  }
  func.func @transform_0(%arg0: i32) -> (i32, i32) {
    %c0_i32 = arith.constant 0 : i32
    %c0_i32_0 = arith.constant 0 : i32
    return %arg0, %c0_i32 : i32, i32
  }
  func.func @transform_1(%arg0: i32) -> (i32, i32) {
    %c0_i32 = arith.constant 0 : i32
    %c0_i32_0 = arith.constant 0 : i32
    %c0_i32_1 = arith.constant 0 : i32
    return %c0_i32, %c0_i32_0 : i32, i32
  }
  func.func @transform_2(%arg0: i32) -> (i32, i32) {
    %c0_i32 = arith.constant 0 : i32
    %c0_i32_0 = arith.constant 0 : i32
    %c0_i32_1 = arith.constant 0 : i32
    return %c0_i32, %c0_i32_0 : i32, i32
  }
  func.func @transform_3(%arg0: i32) -> (i32, i32) {
    %c0_i32 = arith.constant 0 : i32
    %c0_i32_0 = arith.constant 0 : i32
    return %arg0, %c0_i32 : i32, i32
  }
}

module attributes {stable_mosaic.version = 11 : i64} {
  func.func @_mm_stats_kernel(%arg0: i32, %arg1: i32, %arg2: memref<32x128xbf16, #tpu.memory_space<vmem>>, %arg3: memref<128x128xbf16, #tpu.memory_space<vmem>>, %arg4: memref<32x128xf32, #tpu.memory_space<vmem>>, %arg5: memref<1x2x128xf32, #tpu.memory_space<vmem>>, %arg6: memref<32x128xf32, #tpu.memory_space<vmem>>) attributes {dimension_semantics = [#tpu.dimension_semantics<parallel>, #tpu.dimension_semantics<arbitrary>], iteration_bounds = array<i64: 1, 1>, scalar_prefetch = 0 : i64, scratch_operands = 1 : i64, tpu.core_type = #tpu.core_type<tc>, window_params = [{transform_indices = @transform_0, window_bounds = array<i64: 32, 128>}, {transform_indices = @transform_1, window_bounds = array<i64: 128, 128>}, {transform_indices = @transform_2, window_bounds = array<i64: 32, 128>}, {transform_indices = @transform_3, window_bounds = array<i64: 1, 2, 128>}]} {
    %c0_i32 = arith.constant 0 : i32
    %0 = arith.cmpi eq, %arg1, %c0_i32 : i32
    %1 = arith.extui %0 : i1 to i32
    %c0_i32_0 = arith.constant 0 : i32
    %2 = arith.cmpi ne, %1, %c0_i32_0 : i32
    scf.if %2 {
      %cst_10 = arith.constant 0.000000e+00 : f32
      %12 = vector.broadcast %cst_10 : f32 to vector<32x128xf32>
      %c0_11 = arith.constant 0 : index
      %c0_12 = arith.constant 0 : index
      %13 = vector.load %arg6[%c0_11, %c0_12] : memref<32x128xf32, #tpu.memory_space<vmem>>, vector<32x128xf32>
      tpu.vector_store %arg6[%c0_11, %c0_12], %12 {strides = array<i32>} : memref<32x128xf32, #tpu.memory_space<vmem>>, vector<32x128xf32>,
    } else {
    }
    %c0 = arith.constant 0 : index
    %c0_1 = arith.constant 0 : index
    %3 = vector.load %arg6[%c0, %c0_1] : memref<32x128xf32, #tpu.memory_space<vmem>>, vector<32x128xf32>
    %c0_2 = arith.constant 0 : index
    %c0_3 = arith.constant 0 : index
    %4 = vector.load %arg2[%c0_2, %c0_3] : memref<32x128xbf16, #tpu.memory_space<vmem>>, vector<32x128xbf16>
    %c0_4 = arith.constant 0 : index
    %c0_5 = arith.constant 0 : index
    %5 = vector.load %arg3[%c0_4, %c0_5] : memref<128x128xbf16, #tpu.memory_space<vmem>>, vector<128x128xbf16>
    %cst = arith.constant dense<0.000000e+00> : vector<32x128xf32>
    %6 = tpu.matmul %4, %5, %cst {dimension_numbers = #tpu.dot_dimension_numbers<[1], [0], [0], [1], [0, 0, 1, 1], [], []>} : vector<32x128xbf16>, vector<128x128xbf16>, vector<32x128xf32> -> vector<32x128xf32>
    %7 = arith.addf %3, %6 : vector<32x128xf32>
    %c0_6 = arith.constant 0 : index
    %c0_7 = arith.constant 0 : index
    %8 = vector.load %arg6[%c0_6, %c0_7] : memref<32x128xf32, #tpu.memory_space<vmem>>, vector<32x128xf32>
    tpu.vector_store %arg6[%c0_6, %c0_7], %7 {strides = array<i32>} : memref<32x128xf32, #tpu.memory_space<vmem>>, vector<32x128xf32>,
    %c0_i32_8 = arith.constant 0 : i32
    %9 = arith.cmpi eq, %arg1, %c0_i32_8 : i32
    %10 = arith.extui %9 : i1 to i32
    %c0_i32_9 = arith.constant 0 : i32
    %11 = arith.cmpi ne, %10, %c0_i32_9 : i32
    scf.if %11 {
      %c0_10 = arith.constant 0 : index
      %c0_11 = arith.constant 0 : index
      %12 = vector.load %arg6[%c0_10, %c0_11] : memref<32x128xf32, #tpu.memory_space<vmem>>, vector<32x128xf32>
      %c0_12 = arith.constant 0 : index
      %c0_13 = arith.constant 0 : index
      %13 = vector.load %arg4[%c0_12, %c0_13] : memref<32x128xf32, #tpu.memory_space<vmem>>, vector<32x128xf32>
      tpu.vector_store %arg4[%c0_12, %c0_13], %12 {strides = array<i32>} : memref<32x128xf32, #tpu.memory_space<vmem>>, vector<32x128xf32>,
      %cst_14 = arith.constant dense<0.000000e+00> : vector<128xf32>
      %14 = vector.multi_reduction <add>, %12, %cst_14 [0] : vector<32x128xf32> to vector<128xf32>
      %15 = vector.shape_cast %14 : vector<128xf32> to vector<1x128xf32>
      %c0_15 = arith.constant 0 : index
      %c0_16 = arith.constant 0 : index
      %c0_17 = arith.constant 0 : index
      %16 = vector.load %arg5[%c0_15, %c0_16, %c0_17] : memref<1x2x128xf32, #tpu.memory_space<vmem>>, vector<1x1x128xf32>
      %17 = vector.shape_cast %16 : vector<1x1x128xf32> to vector<1x128xf32>
      %18 = vector.shape_cast %15 : vector<1x128xf32> to vector<1x1x128xf32>
      tpu.vector_store %arg5[%c0_15, %c0_16, %c0_17], %18 {strides = array<i32>} : memref<1x2x128xf32, #tpu.memory_space<vmem>>, vector<1x1x128xf32>,
      %19 = arith.mulf %12, %12 : vector<32x128xf32>
      %cst_18 = arith.constant dense<0.000000e+00> : vector<128xf32>
      %20 = vector.multi_reduction <add>, %19, %cst_18 [0] : vector<32x128xf32> to vector<128xf32>
      %21 = vector.shape_cast %20 : vector<128xf32> to vector<1x128xf32>
      %c0_19 = arith.constant 0 : index
      %c1 = arith.constant 1 : index
      %c0_20 = arith.constant 0 : index
      %22 = vector.load %arg5[%c0_19, %c1, %c0_20] : memref<1x2x128xf32, #tpu.memory_space<vmem>>, vector<1x1x128xf32>
      %23 = vector.shape_cast %22 : vector<1x1x128xf32> to vector<1x128xf32>
      %24 = vector.shape_cast %21 : vector<1x128xf32> to vector<1x1x128xf32>
      tpu.vector_store %arg5[%c0_19, %c1, %c0_20], %24 {strides = array<i32>} : memref<1x2x128xf32, #tpu.memory_space<vmem>>, vector<1x1x128xf32>,
    } else {
    }
    return
  }
  func.func @transform_0(%arg0: i32, %arg1: i32) -> (i32, i32) {
    %c0_i32 = arith.constant 0 : i32
    return %arg0, %arg1 : i32, i32
  }
  func.func @transform_1(%arg0: i32, %arg1: i32) -> (i32, i32) {
    %c0_i32 = arith.constant 0 : i32
    %c0_i32_0 = arith.constant 0 : i32
    return %arg1, %c0_i32 : i32, i32
  }
  func.func @transform_2(%arg0: i32, %arg1: i32) -> (i32, i32) {
    %c0_i32 = arith.constant 0 : i32
    %c0_i32_0 = arith.constant 0 : i32
    return %arg0, %c0_i32 : i32, i32
  }
  func.func @transform_3(%arg0: i32, %arg1: i32) -> (i32, i32, i32) {
    %c0_i32 = arith.constant 0 : i32
    %c0_i32_0 = arith.constant 0 : i32
    %c0_i32_1 = arith.constant 0 : i32
    return %arg0, %c0_i32, %c0_i32_0 : i32, i32, i32
  }
}

module attributes {stable_mosaic.version = 11 : i64} {
  func.func @_mm_act_kernel(%arg0: i32, %arg1: i32, %arg2: memref<16x256xbf16, #tpu.memory_space<vmem>>, %arg3: memref<256x128xbf16, #tpu.memory_space<vmem>>, %arg4: memref<16x128xf32, #tpu.memory_space<vmem>>, %arg5: memref<16x128xf32, #tpu.memory_space<vmem>>) attributes {dimension_semantics = [#tpu.dimension_semantics<parallel>, #tpu.dimension_semantics<arbitrary>], iteration_bounds = array<i64: 1, 1>, scalar_prefetch = 0 : i64, scratch_operands = 1 : i64, tpu.core_type = #tpu.core_type<tc>, window_params = [{transform_indices = @transform_0, window_bounds = array<i64: 16, 256>}, {transform_indices = @transform_1, window_bounds = array<i64: 256, 128>}, {transform_indices = @transform_2, window_bounds = array<i64: 16, 128>}]} {
    %c0_i32 = arith.constant 0 : i32
    %0 = arith.cmpi eq, %arg1, %c0_i32 : i32
    %1 = arith.extui %0 : i1 to i32
    %c0_i32_0 = arith.constant 0 : i32
    %2 = arith.cmpi ne, %1, %c0_i32_0 : i32
    scf.if %2 {
      %cst_10 = arith.constant 0.000000e+00 : f32
      %12 = vector.broadcast %cst_10 : f32 to vector<16x128xf32>
      %c0_11 = arith.constant 0 : index
      %c0_12 = arith.constant 0 : index
      %13 = vector.load %arg5[%c0_11, %c0_12] : memref<16x128xf32, #tpu.memory_space<vmem>>, vector<16x128xf32>
      tpu.vector_store %arg5[%c0_11, %c0_12], %12 {strides = array<i32>} : memref<16x128xf32, #tpu.memory_space<vmem>>, vector<16x128xf32>,
    } else {
    }
    %c0 = arith.constant 0 : index
    %c0_1 = arith.constant 0 : index
    %3 = vector.load %arg5[%c0, %c0_1] : memref<16x128xf32, #tpu.memory_space<vmem>>, vector<16x128xf32>
    %c0_2 = arith.constant 0 : index
    %c0_3 = arith.constant 0 : index
    %4 = vector.load %arg2[%c0_2, %c0_3] : memref<16x256xbf16, #tpu.memory_space<vmem>>, vector<16x256xbf16>
    %c0_4 = arith.constant 0 : index
    %c0_5 = arith.constant 0 : index
    %5 = vector.load %arg3[%c0_4, %c0_5] : memref<256x128xbf16, #tpu.memory_space<vmem>>, vector<256x128xbf16>
    %cst = arith.constant dense<0.000000e+00> : vector<16x128xf32>
    %6 = tpu.matmul %4, %5, %cst {dimension_numbers = #tpu.dot_dimension_numbers<[1], [0], [0], [1], [0, 0, 1, 1], [], []>} : vector<16x256xbf16>, vector<256x128xbf16>, vector<16x128xf32> -> vector<16x128xf32>
    %7 = arith.addf %3, %6 : vector<16x128xf32>
    %c0_6 = arith.constant 0 : index
    %c0_7 = arith.constant 0 : index
    %8 = vector.load %arg5[%c0_6, %c0_7] : memref<16x128xf32, #tpu.memory_space<vmem>>, vector<16x128xf32>
    tpu.vector_store %arg5[%c0_6, %c0_7], %7 {strides = array<i32>} : memref<16x128xf32, #tpu.memory_space<vmem>>, vector<16x128xf32>,
    %c0_i32_8 = arith.constant 0 : i32
    %9 = arith.cmpi eq, %arg1, %c0_i32_8 : i32
    %10 = arith.extui %9 : i1 to i32
    %c0_i32_9 = arith.constant 0 : i32
    %11 = arith.cmpi ne, %10, %c0_i32_9 : i32
    scf.if %11 {
      %c0_10 = arith.constant 0 : index
      %c0_11 = arith.constant 0 : index
      %12 = vector.load %arg5[%c0_10, %c0_11] : memref<16x128xf32, #tpu.memory_space<vmem>>, vector<16x128xf32>
      %c0_12 = arith.constant 0 : index
      %c0_13 = arith.constant 0 : index
      %13 = vector.load %arg4[%c0_12, %c0_13] : memref<16x128xf32, #tpu.memory_space<vmem>>, vector<16x128xf32>
      tpu.vector_store %arg4[%c0_12, %c0_13], %12 {strides = array<i32>} : memref<16x128xf32, #tpu.memory_space<vmem>>, vector<16x128xf32>,
    } else {
    }
    return
  }
  func.func @transform_0(%arg0: i32, %arg1: i32) -> (i32, i32) {
    %c0_i32 = arith.constant 0 : i32
    return %arg0, %arg1 : i32, i32
  }
  func.func @transform_1(%arg0: i32, %arg1: i32) -> (i32, i32) {
    %c0_i32 = arith.constant 0 : i32
    %c0_i32_0 = arith.constant 0 : i32
    return %arg1, %c0_i32 : i32, i32
  }
  func.func @transform_2(%arg0: i32, %arg1: i32) -> (i32, i32) {
    %c0_i32 = arith.constant 0 : i32
    %c0_i32_0 = arith.constant 0 : i32
    return %arg0, %c0_i32 : i32, i32
  }
}

</mosaic_0001>

<bundles_post_ra>
// kernel: _lambda_.4
= control target key start
LH: loop header
LB: loop body
LE: loop exit
PB: predicated region body
PF: predicated region fallthrough
CT: control target
= control target key end

     0   :  { %s719_s1 = inlined_call_operand.vmem [shape: bf16[128,128], index: 1, kind: input, shape index: {}]   ;;  %s720_s0 = inlined_call_operand.vmem [shape: bf16[128,128], index: 0, kind: input, shape index: {}]   ;;  %s721_s2 = inlined_call_operand.vmem [shape: bf16[128,128], index: 2, kind: output, shape index: {}]  }
   0x1   :  { %v615_v0 = vld [vmem:[%s719_s1] sm:$0xff]   ;;  %v616_v1 = vld [vmem:[%s719_s1 + $0x8] sm:$0xff]   ;;  %v617_v2 = vld [vmem:[%s719_s1 + $0x10] sm:$0xff]  }
   0x2   :  { %567 = vmatprep.subr.bf16.mxu0 %v615_v0  ;;  %599 = vmatprep.subr.bf16.mxu1 %v615_v0  ;;  %v618_v3 = vld [vmem:[%s719_s1 + $0x18] sm:$0xff]   ;;  %v623_v4 = vld [vmem:[%s720_s0] sm:$0xff]   ;;  %v620_v7 = vld [vmem:[%s719_s1 + $0x28] sm:$0xff]  }
   0x3   :  { %568 = vmatpush3.bf16.msra.mxu0 %v615_v0  ;;  %607 = vmatpush3.bf16.msra.mxu1 %v615_v0  ;;  %v624_v5 = vld [vmem:[%s720_s0 + $0x20] sm:$0xff]   ;;  %v621_v8 = vld [vmem:[%s719_s1 + $0x30] sm:$0xff]   ;;  %v622_v9 = vld [vmem:[%s719_s1 + $0x38] sm:$0xff]  }
   0x4   :  { %569 = vmatprep.subr.bf16.mxu0 %v616_v1  ;;  %600 = vmatprep.subr.bf16.mxu1 %v616_v1  ;;  %v619_v6 = vld [vmem:[%s719_s1 + $0x20] sm:$0xff]   ;;  %v625_v10 = vld [vmem:[%s720_s0 + $0x8] sm:$0xff]   ;;  %v627_v12 = vld [vmem:[%s720_s0 + $0x10] sm:$0xff]  }
   0x5   :  { %583 = vmatprep.mubr.bf16.mxu0 %v623_v4  ;;  %591 = vmatprep.mubr.bf16.mxu1 %v624_v5  ;;  %v626_v11 = vld [vmem:[%s720_s0 + $0x28] sm:$0xff]   ;;  %v628_v13 = vld [vmem:[%s720_s0 + $0x30] sm:$0xff]   ;;  %v629_v14 = vld [vmem:[%s720_s0 + $0x18] sm:$0xff]  }
   0x6   :  { %v630_v15 = vld [vmem:[%s720_s0 + $0x38] sm:$0xff]  }
   0x7   :  { %570 = vmatpush3.bf16.msra.mxu0 %v616_v1  ;;  %608 = vmatpush3.bf16.msra.mxu1 %v616_v1 }
   0x8   :  { %571 = vmatprep.subr.bf16.mxu0 %v617_v2  ;;  %601 = vmatprep.subr.bf16.mxu1 %v617_v2 }
   0xb   :  { %572 = vmatpush3.bf16.msra.mxu0 %v617_v2  ;;  %609 = vmatpush3.bf16.msra.mxu1 %v617_v2 }
   0xc   :  { %573 = vmatprep.subr.bf16.mxu0 %v618_v3  ;;  %602 = vmatprep.subr.bf16.mxu1 %v618_v3 }
   0xf   :  { %574 = vmatpush3.bf16.msra.mxu0 %v618_v3  ;;  %610 = vmatpush3.bf16.msra.mxu1 %v618_v3 }
  0x10   :  { %575 = vmatprep.subr.bf16.mxu0 %v619_v6  ;;  %603 = vmatprep.subr.bf16.mxu1 %v619_v6 }
  0x13   :  { %576 = vmatpush3.bf16.msra.mxu0 %v619_v6  ;;  %611 = vmatpush3.bf16.msra.mxu1 %v619_v6 }
  0x14   :  { %577 = vmatprep.subr.bf16.mxu0 %v620_v7  ;;  %604 = vmatprep.subr.bf16.mxu1 %v620_v7 }
  0x17   :  { %578 = vmatpush3.bf16.msra.mxu0 %v620_v7  ;;  %612 = vmatpush3.bf16.msra.mxu1 %v620_v7 }
  0x18   :  { %579 = vmatprep.subr.bf16.mxu0 %v621_v8  ;;  %605 = vmatprep.subr.bf16.mxu1 %v621_v8 }
  0x1b   :  { %580 = vmatpush3.bf16.msra.mxu0 %v621_v8  ;;  %613 = vmatpush3.bf16.msra.mxu1 %v621_v8 }
  0x1c   :  { %581 = vmatprep.subr.bf16.mxu0 %v622_v9  ;;  %606 = vmatprep.subr.bf16.mxu1 %v622_v9 }
  0x1f   :  { %582 = vmatpush3.bf16.msra.mxu0 %v622_v9  ;;  %614 = vmatpush3.bf16.msra.mxu1 %v622_v9 }
  0x22   :  { %584 = vmatmul.mubr.bf16.vlgmr.msra.gmra.mrb[0].mxu0 %v625_v10  ;;  %592 = vmatmul.mubr.bf16.vlgmr.msra.gmra.mrb[0].mxu1 %v626_v11 }
  0x23   :  { %587 = vmatprep.mubr.bf16.mxu0 %v627_v12  ;;  %595 = vmatprep.mubr.bf16.mxu1 %v628_v13 }
  0x2a   :  { %588 = vmatmul.mubr.bf16.gmra.mrb[4].mxu0 %v629_v14  ;;  %596 = vmatmul.mubr.bf16.gmra.mrb[4].mxu1 %v630_v15 }
  0xf5   :  { %v585_v16 = vpop.f32.mrb[0].mxu0  ;;  %v593_v17 = vpop.f32.mrb[0].mxu1 }
  0xf6   :  { %vm326_vm0 = vcmp.ge.f32.partialorder %v585_v16, 0.0  ;;  %v342_v18 = vmul.f32 0.2, %v585_v16  ;;  %v350_v19 = vmul.f32 0.2, %v593_v17  ;;  %vm334_vm1 = vcmp.ge.f32.partialorder %v593_v17, 0.0 }
  0xf7   :  { %v210_v20 = vpop.f32.mrb[1].mxu0  ;;  %v242_v21 = vpop.f32.mrb[1].mxu1 }
  0xf8   :  { %v340_v22 = vmul.f32 0.2, %v210_v20  ;;  %v586_v23 = vpop.f32.mrb[2].mxu0  ;;  %v594_v24 = vpop.f32.mrb[2].mxu1  ;;  %v358_v25 = vsel %vm326_vm0, %v585_v16, %v342_v18  ;;  %v348_v26 = vmul.f32 0.2, %v242_v21  ;;  %v366_v28 = vsel %vm334_vm1, %v593_v17, %v350_v19 }
  0xf9   :  { %vm327_vm2 = vcmp.ge.f32.partialorder %v586_v23, 0.0  ;;  %v343_v27 = vmul.f32 0.2, %v586_v23  ;;  %vm324_vm3 = vcmp.ge.f32.partialorder %v210_v20, 0.0  ;;  %vm335_vm4 = vcmp.ge.f32.partialorder %v594_v24, 0.0  ;;  %v213_v30 = vpop.f32.mrb[3].mxu0 }
  0xfa   :  { %v351_v29 = vmul.f32 0.2, %v594_v24  ;;  %v245_v31 = vpop.f32.mrb[3].mxu1  ;;  %vm332_vm5 = vcmp.ge.f32.partialorder %v242_v21, 0.0  ;;  %vm325_vm6 = vcmp.ge.f32.partialorder %v213_v30, 0.0  ;;  %v356_v37 = vsel %vm324_vm3, %v210_v20, %v340_v22 }
  0xfb   :  { %v359_v32 = vsel %vm327_vm2, %v586_v23, %v343_v27  ;;  %v341_v33 = vmul.f32 0.2, %v213_v30  ;;  %vm333_vm7 = vcmp.ge.f32.partialorder %v245_v31, 0.0  ;;  %v349_v36 = vmul.f32 0.2, %v245_v31 }
  0xfc   :  { %v512_v34 = vpack.c.bf16 %v359_v32, %v358_v25  ;;  %v367_v35 = vsel %vm335_vm4, %v594_v24, %v351_v29  ;;  %v364_v42 = vsel %vm332_vm5, %v242_v21, %v348_v26 }
  0xfd   :  { %v532_v38 = vpack.c.bf16 %v367_v35, %v366_v28  ;;  %v357_v39 = vsel %vm325_vm6, %v213_v30, %v341_v33  ;;  %v589_v40 = vpop.f32.mrb[4].mxu0  ;;  %v597_v41 = vpop.f32.mrb[4].mxu1  ;;  %v365_v44 = vsel %vm333_vm7, %v245_v31, %v349_v36 }
  0xfe   :  { %544 = vst [vmem:[%s721_s2 + $0x8] sm:$0xff] %v512_v34   ;;  %v507_v43 = vpack.c.bf16 %v357_v39, %v356_v37  ;;  %v346_v45 = vmul.f32 0.2, %v589_v40  ;;  %v226_v46 = vpop.f32.mrb[5].mxu0  ;;  %v258_v47 = vpop.f32.mrb[5].mxu1  ;;  %v527_v48 = vpack.c.bf16 %v365_v44, %v364_v42  ;;  %vm330_vm8 = vcmp.ge.f32.partialorder %v589_v40, 0.0 }
  0xff   :  { %548 = vst [vmem:[%s721_s2 + $0x28] sm:$0xff] %v532_v38   ;;  %v354_v49 = vmul.f32 0.2, %v597_v41  ;;  %v590_v50 = vpop.f32.mrb[6].mxu0  ;;  %v598_v51 = vpop.f32.mrb[6].mxu1  ;;  %vm338_vm9 = vcmp.ge.f32.partialorder %v597_v41, 0.0 }
 0x100   :  { %508 = vst [vmem:[%s721_s2] sm:$0xff] %v507_v43   ;;  %v344_v52 = vmul.f32 0.2, %v226_v46  ;;  %v352_v53 = vmul.f32 0.2, %v258_v47  ;;  %v229_v54 = vpop.f32.mrb[7].mxu0  ;;  %547 = vst [vmem:[%s721_s2 + $0x20] sm:$0xff] %v527_v48   ;;  %v362_v57 = vsel %vm330_vm8, %v589_v40, %v346_v45 }
 0x101   :  { %vm328_vm10 = vcmp.ge.f32.partialorder %v226_v46, 0.0  ;;  %vm331_vm11 = vcmp.ge.f32.partialorder %v590_v50, 0.0  ;;  %v347_v55 = vmul.f32 0.2, %v590_v50  ;;  %vm339_vm12 = vcmp.ge.f32.partialorder %v598_v51, 0.0  ;;  %v261_v56 = vpop.f32.mrb[7].mxu1 }
 0x102   :  { %vm336_vm13 = vcmp.ge.f32.partialorder %v258_v47, 0.0  ;;  %v355_v58 = vmul.f32 0.2, %v598_v51  ;;  %vm329_vm14 = vcmp.ge.f32.partialorder %v229_v54, 0.0  ;;  %v345_v60 = vmul.f32 0.2, %v229_v54 }
 0x103   :  { %v363_v59 = vsel %vm331_vm11, %v590_v50, %v347_v55  ;;  %vm337_vm15 = vcmp.ge.f32.partialorder %v261_v56, 0.0  ;;  %v353_v61 = vmul.f32 0.2, %v261_v56  ;;  %v370_v62 = vsel %vm338_vm9, %v597_v41, %v354_v49 }
 0x104   :  { %v360_v63 = vsel %vm328_vm10, %v226_v46, %v344_v52  ;;  %v522_v0 = vpack.c.bf16 %v363_v59, %v362_v57  ;;  %v371_v1 = vsel %vm339_vm12, %v598_v51, %v355_v58  ;;  %v368_v2 = vsel %vm336_vm13, %v258_v47, %v352_v53 }
 0x105   :  { %v542_v3 = vpack.c.bf16 %v371_v1, %v370_v62  ;;  %v361_v4 = vsel %vm329_vm14, %v229_v54, %v345_v60  ;;  %v369_v5 = vsel %vm337_vm15, %v261_v56, %v353_v61 }
 0x106   :  { %546 = vst [vmem:[%s721_s2 + $0x18] sm:$0xff] %v522_v0   ;;  %v517_v6 = vpack.c.bf16 %v361_v4, %v360_v63  ;;  %v537_v7 = vpack.c.bf16 %v369_v5, %v368_v2 }
 0x107   :  { %550 = vst [vmem:[%s721_s2 + $0x38] sm:$0xff] %v542_v3  }
 0x108   :  { %545 = vst [vmem:[%s721_s2 + $0x10] sm:$0xff] %v517_v6   ;;  %549 = vst [vmem:[%s721_s2 + $0x30] sm:$0xff] %v537_v7  }

// kernel: _lambda_.6
= control target key start
LH: loop header
LB: loop body
LE: loop exit
PB: predicated region body
PF: predicated region fallthrough
CT: control target
= control target key end

     0   :  { %s141_s0 = inlined_call_operand.vmem [shape: f32[32,128], index: 0, kind: input, shape index: {}]   ;;  %s142_s1 = inlined_call_operand.vmem [shape: f32[1,128], index: 1, kind: input, shape index: {}]   ;;  %s143_s2 = inlined_call_operand.vmem [shape: f32[1,128], index: 2, kind: input, shape index: {}]   ;;  %s144_s3 = inlined_call_operand.vmem [shape: bf16[32,128], index: 3, kind: output, shape index: {}]  }
   0x1   :  { %v14_v0 = vld [vmem:[%s141_s0] sm:$0xff]  ;;  %v15_v1 = vld [vmem:[%s141_s0 + $0x8] sm:$0xff]  ;;  %v16_v6 = vld [vmem:[%s141_s0 + $0x10] sm:$0xff] }
   0x2   :  { %v76_v2 = vld [vmem:[%s142_s1] ss:$0 sm:$0xff]  ;;  %v17_v7 = vld [vmem:[%s141_s0 + $0x18] sm:$0xff] }
   0x3   :  { %v25_v3 = vmul.f32 %v76_v2, %v14_v0  ;;  %v26_v4 = vmul.f32 %v76_v2, %v15_v1  ;;  %v77_v5 = vld [vmem:[%s143_s2] ss:$0 sm:$0xff]  ;;  %v27_v8 = vmul.f32 %v76_v2, %v16_v6  ;;  %v28_v9 = vmul.f32 %v76_v2, %v17_v7 }
   0x5   :  { %v36_v10 = vadd.f32 %v77_v5, %v25_v3  ;;  %v37_v11 = vadd.f32 %v77_v5, %v26_v4  ;;  %v38_v12 = vadd.f32 %v77_v5, %v27_v8  ;;  %v39_v13 = vadd.f32 %v77_v5, %v28_v9 }
   0x7   :  { %vm40_vm0 = vcmp.ge.f32.partialorder %v36_v10, 0.0  ;;  %vm41_vm1 = vcmp.ge.f32.partialorder %v37_v11, 0.0  ;;  %v44_v14 = vmul.f32 0.2, %v36_v10  ;;  %v45_v15 = vmul.f32 0.2, %v37_v11 }
   0x8   :  { %vm42_vm2 = vcmp.ge.f32.partialorder %v38_v12, 0.0  ;;  %vm43_vm3 = vcmp.ge.f32.partialorder %v39_v13, 0.0  ;;  %v46_v16 = vmul.f32 0.2, %v38_v12  ;;  %v47_v17 = vmul.f32 0.2, %v39_v13 }
   0x9   :  { %v48_v18 = vsel %vm40_vm0, %v36_v10, %v44_v14  ;;  %v49_v19 = vsel %vm41_vm1, %v37_v11, %v45_v15 }
   0xa   :  { %v89_v20 = vpack.c.bf16 %v49_v19, %v48_v18  ;;  %v50_v21 = vsel %vm42_vm2, %v38_v12, %v46_v16  ;;  %v51_v22 = vsel %vm43_vm3, %v39_v13, %v47_v17 }
   0xb   :  { %v94_v23 = vpack.c.bf16 %v51_v22, %v50_v21 }
   0xc   :  { %90 = vst [vmem:[%s144_s3] sm:$0xff] %v89_v20  }
   0xd   :  { %96 = vst [vmem:[%s144_s3 + $0x8] sm:$0xff] %v94_v23  }

// kernel: _lambda_.5
= control target key start
LH: loop header
LB: loop body
LE: loop exit
PB: predicated region body
PF: predicated region fallthrough
CT: control target
= control target key end

     0   :  { %s324_s1 = inlined_call_operand.vmem [shape: bf16[128,128], index: 1, kind: input, shape index: {}]   ;;  %s325_s0 = inlined_call_operand.vmem [shape: bf16[32,128], index: 0, kind: input, shape index: {}]   ;;  %s326_s2 = inlined_call_operand.vmem [shape: f32[32,128], index: 2, kind: output, shape index: {0}]   ;;  %s327_s3 = inlined_call_operand.vmem [shape: f32[1,2,128], index: 3, kind: output, shape index: {1}]  }
   0x1   :  { %v246_v0 = vld [vmem:[%s324_s1] sm:$0xff]   ;;  %v247_v1 = vld [vmem:[%s324_s1 + $0x8] sm:$0xff]   ;;  %v248_v2 = vld [vmem:[%s324_s1 + $0x10] sm:$0xff]  }
   0x2   :  { %226 = vmatprep.subr.bf16.mxu0 %v246_v0  ;;  %v249_v3 = vld [vmem:[%s324_s1 + $0x18] sm:$0xff]   ;;  %v254_v4 = vld [vmem:[%s325_s0] sm:$0xff]   ;;  %v251_v6 = vld [vmem:[%s324_s1 + $0x28] sm:$0xff]  }
   0x3   :  { %227 = vmatpush3.bf16.msra.mxu0 %v246_v0  ;;  %242 = vmatprep.mubr.bf16.mxu0 %v254_v4  ;;  %v250_v5 = vld [vmem:[%s324_s1 + $0x20] sm:$0xff]   ;;  %v252_v7 = vld [vmem:[%s324_s1 + $0x30] sm:$0xff]   ;;  %v253_v8 = vld [vmem:[%s324_s1 + $0x38] sm:$0xff]  }
   0x4   :  { %228 = vmatprep.subr.bf16.mxu0 %v247_v1  ;;  %v255_v9 = vld [vmem:[%s325_s0 + $0x8] sm:$0xff]  }
   0x7   :  { %229 = vmatpush3.bf16.msra.mxu0 %v247_v1 }
   0x8   :  { %230 = vmatprep.subr.bf16.mxu0 %v248_v2 }
   0xb   :  { %231 = vmatpush3.bf16.msra.mxu0 %v248_v2 }
   0xc   :  { %232 = vmatprep.subr.bf16.mxu0 %v249_v3 }
   0xf   :  { %233 = vmatpush3.bf16.msra.mxu0 %v249_v3 }
  0x10   :  { %234 = vmatprep.subr.bf16.mxu0 %v250_v5 }
  0x13   :  { %235 = vmatpush3.bf16.msra.mxu0 %v250_v5 }
  0x14   :  { %236 = vmatprep.subr.bf16.mxu0 %v251_v6 }
  0x17   :  { %237 = vmatpush3.bf16.msra.mxu0 %v251_v6 }
  0x18   :  { %238 = vmatprep.subr.bf16.mxu0 %v252_v7 }
  0x1b   :  { %239 = vmatpush3.bf16.msra.mxu0 %v252_v7 }
  0x1c   :  { %240 = vmatprep.subr.bf16.mxu0 %v253_v8 }
  0x1f   :  { %241 = vmatpush3.bf16.msra.mxu0 %v253_v8 }
  0x22   :  { %243 = vmatmul.mubr.bf16.vlgmr.msra.gmra.mrb[0].mxu0 %v255_v9 }
  0xf5   :  { %v244_v10 = vpop.f32.mrb[0].mxu0 }
  0xf6   :  { %172 = vst [vmem:[%s326_s2 + $0x10] sm:$0xff] %v244_v10  ;;  %v140_v11 = vpop.f32.mrb[1].mxu0  ;;  %v186_v17 = vmul.f32 %v244_v10, %v244_v10 }
  0xf7   :  { %170 = vst [vmem:[%s326_s2] sm:$0xff] %v140_v11  ;;  %v245_v12 = vpop.f32.mrb[2].mxu0  ;;  %v184_v14 = vmul.f32 %v140_v11, %v140_v11 }
  0xf8   :  { %173 = vst [vmem:[%s326_s2 + $0x18] sm:$0xff] %v245_v12  ;;  %v143_v13 = vpop.f32.mrb[3].mxu0  ;;  %v187_v20 = vmul.f32 %v245_v12, %v245_v12 }
  0xf9   :  { %171 = vst [vmem:[%s326_s2 + $0x8] sm:$0xff] %v143_v13  ;;  %v174_v15 = vadd.f32 %v143_v13, %v140_v11  ;;  %v185_v16 = vmul.f32 %v143_v13, %v143_v13 }
  0xfb   :  { %v175_v18 = vadd.f32 %v244_v10, %v174_v15  ;;  %v188_v19 = vadd.f32 %v185_v16, %v184_v14 }
  0xfd   :  { %v176_v21 = vadd.f32 %v245_v12, %v175_v18  ;;  %v189_v22 = vadd.f32 %v188_v19, %v186_v17 }
  0xff   :  { %v177_v23 = vrot.slane %v176_v21, 4  ;;  %v190_v24 = vadd.f32 %v189_v22, %v187_v20 }
 0x101   :  { %v178_v25 = vadd.f32 %v177_v23, %v176_v21  ;;  %v191_v26 = vrot.slane %v190_v24, 4 }
 0x103   :  { %v179_v27 = vrot.slane %v178_v25, 2  ;;  %v192_v28 = vadd.f32 %v191_v26, %v190_v24 }
 0x105   :  { %v180_v29 = vadd.f32 %v179_v27, %v178_v25  ;;  %v193_v30 = vrot.slane %v192_v28, 2 }
 0x107   :  { %v181_v31 = vrot.slane %v180_v29, 1  ;;  %v194_v32 = vadd.f32 %v193_v30, %v192_v28 }
 0x109   :  { %v182_v33 = vadd.f32 %v181_v31, %v180_v29  ;;  %v195_v34 = vrot.slane %v194_v32, 1 }
 0x10b   :  { %183 = vst [vmem:[%s327_s3] sm:$0x1] %v182_v33  ;;  %v196_v35 = vadd.f32 %v195_v34, %v194_v32 }
 0x10d   :  { %197 = vst [vmem:[%s327_s3 + $0x1] sm:$0x1] %v196_v35 }

// kernel: _lambda_.7
= control target key start
LH: loop header
LB: loop body
LE: loop exit
PB: predicated region body
PF: predicated region fallthrough
CT: control target
= control target key end

     0   :  { %s350_s1 = inlined_call_operand.vmem [shape: bf16[256,128], index: 1, kind: input, shape index: {}]   ;;  %s351_s0 = inlined_call_operand.vmem [shape: bf16[16,256], index: 0, kind: input, shape index: {}]   ;;  %s352_s2 = inlined_call_operand.vmem [shape: f32[16,128], index: 2, kind: output, shape index: {}]  }
   0x1   :  { %v256_v0 = vld [vmem:[%s350_s1 + $0x40] sm:$0xff]   ;;  %v258_v2 = vld [vmem:[%s350_s1 + $0x48] sm:$0xff]   ;;  %v260_v4 = vld [vmem:[%s350_s1 + $0x50] sm:$0xff]  }
   0x2   :  { %v257_v1 = vld [vmem:[%s350_s1] sm:$0xff]   ;;  %234 = vmatprep.subr.bf16.mxu0 %v256_v0  ;;  %v259_v3 = vld [vmem:[%s350_s1 + $0x8] sm:$0xff]   ;;  %v261_v5 = vld [vmem:[%s350_s1 + $0x10] sm:$0xff]  }
   0x3   :  { %235 = vmatpush3.bf16.msra.mxu0 %v257_v1  ;;  %v262_v6 = vld [vmem:[%s350_s1 + $0x58] sm:$0xff]   ;;  %v264_v8 = vld [vmem:[%s350_s1 + $0x60] sm:$0xff]   ;;  %v266_v10 = vld [vmem:[%s350_s1 + $0x68] sm:$0xff]  }
   0x4   :  { %236 = vmatprep.subr.bf16.mxu0 %v258_v2  ;;  %v263_v7 = vld [vmem:[%s350_s1 + $0x18] sm:$0xff]   ;;  %v265_v9 = vld [vmem:[%s350_s1 + $0x20] sm:$0xff]   ;;  %v267_v12 = vld [vmem:[%s350_s1 + $0x28] sm:$0xff]  }
   0x5   :  { %v274_v11 = vld [vmem:[%s351_s0 + $0x4] ss:$8 sps:$4 sm:$0xff]   ;;  %v268_v13 = vld [vmem:[%s350_s1 + $0x70] sm:$0xff]   ;;  %v270_v15 = vld [vmem:[%s350_s1 + $0x78] sm:$0xff]  }
   0x6   :  { %192 = vmatprep.mubr.bf16.mxu0 %v274_v11  ;;  %v269_v14 = vld [vmem:[%s350_s1 + $0x30] sm:$0xff]   ;;  %v271_v16 = vld [vmem:[%s350_s1 + $0x38] sm:$0xff]   ;;  %v272_v17 = vld [vmem:[%s351_s0] ss:$8 sps:$4 sm:$0xff]  }
   0x7   :  { %237 = vmatpush3.bf16.msra.mxu0 %v259_v3 }
   0x8   :  { %238 = vmatprep.subr.bf16.mxu0 %v260_v4 }
   0xb   :  { %239 = vmatpush3.bf16.msra.mxu0 %v261_v5 }
   0xc   :  { %240 = vmatprep.subr.bf16.mxu0 %v262_v6 }
   0xf   :  { %241 = vmatpush3.bf16.msra.mxu0 %v263_v7 }
  0x10   :  { %242 = vmatprep.subr.bf16.mxu0 %v264_v8 }
  0x13   :  { %243 = vmatpush3.bf16.msra.mxu0 %v265_v9 }
  0x14   :  { %244 = vmatprep.subr.bf16.mxu0 %v266_v10 }
  0x17   :  { %245 = vmatpush3.bf16.msra.mxu0 %v267_v12 }
  0x18   :  { %246 = vmatprep.subr.bf16.mxu0 %v268_v13 }
  0x1b   :  { %247 = vmatpush3.bf16.msra.mxu0 %v269_v14 }
  0x1c   :  { %248 = vmatprep.subr.bf16.mxu0 %v270_v15 }
  0x1f   :  { %249 = vmatpush3.bf16.msra.mxu0 %v271_v16 }
  0x22   :  { %193 = vmatmul.mubr.bf16.vlgmr.msra.gmra.mrb[0].mxu0 %v272_v17 }
  0xf5   :  { %v250_v18 = vpop.f32.mrb[0].mxu0 }
  0xf6   :  { %v251_v19 = vpop.f32.mrb[1].mxu0 }
  0xf7   :  { %v252_v20 = vadd.f32 %v251_v19, %v250_v18  ;;  %v253_v21 = vpop.f32.mrb[2].mxu0 }
  0xf8   :  { %v254_v22 = vpop.f32.mrb[3].mxu0 }
  0xf9   :  { %210 = vst [vmem:[%s352_s2] sm:$0xff] %v252_v20  ;;  %v255_v23 = vadd.f32 %v254_v22, %v253_v21 }
  0xfb   :  { %211 = vst [vmem:[%s352_s2 + $0x8] sm:$0xff] %v255_v23 }

</bundles_post_ra>
